<compile_context>
chip_gen: v7x
topology: tpu7x:2x2x1
jax: 0.10.0
libtpu: 0.0.40
codegen_flags: <defaults>
</compile_context>

<pallas_src>
import jax
import jax.numpy as jnp
from jax import lax
from jax.experimental import pallas as pl
from jax.experimental.pallas import tpu as pltpu

_GELU_C = 0.7978845608028654  # sqrt(2/pi)


def _make_kernel(H, W, has_projection, mxu_bf16):
    """Build the fused XceptionBlock kernel for static (H, W) and config."""
    HW = H * W
    in_dt = jnp.bfloat16 if mxu_bf16 else jnp.float32

    def kernel(x_ref, dw1_ref, pw1t_ref, dw2_ref, pw2t_ref, vecs_ref, *rest):
        if has_projection:
            projt_ref, out_ref = rest
        else:
            (out_ref,) = rest

        x = x_ref[0]            # (Cin, HW)  -- spatial on lanes
        vecs = vecs_ref[...]    # (Cout, 7)  -- [pw1_b, ln1_w, ln1_b, pw2_b, ln2_w, ln2_b, proj_b]

        # Replicate-padding edge masks, shared by both depthwise convs.
        hw = lax.broadcasted_iota(jnp.int32, (1, HW), 1)
        w_idx = hw % W
        col_is0 = w_idx == 0
        col_isW1 = w_idx == W - 1
        row_is0 = hw < W
        row_isH1 = hw >= HW - W

        def dwconv3x3(y, dw):
            # y: (C, HW); dw: (C, 10) = 9 taps (row-major 3x3) + bias.
            # Shifts along the flattened HW axis via XLU rolls; edge columns/rows
            # fixed up with a single select (replicate padding).
            ym = jnp.where(col_is0, y, pltpu.roll(y, 1, axis=1))          # (h, w-1)
            yp = jnp.where(col_isW1, y, pltpu.roll(y, HW - 1, axis=1))    # (h, w+1)
            rows = [ym * dw[:, 3 * di + 0:3 * di + 1]
                    + y * dw[:, 3 * di + 1:3 * di + 2]
                    + yp * dw[:, 3 * di + 2:3 * di + 3]
                    for di in range(3)]
            top = jnp.where(row_is0, rows[0], pltpu.roll(rows[0], W, axis=1))       # (h-1, .)
            bot = jnp.where(row_isH1, rows[2], pltpu.roll(rows[2], HW - W, axis=1))  # (h+1, .)
            return top + rows[1] + bot + dw[:, 9:10]

        def groupnorm_gelu(y, w, b):
            # GroupNorm(1, C): two-pass stats over the whole (C, HW) sample,
            # per-channel affine; then tanh-form GELU (EUP slot).
            inv_n = 1.0 / y.size
            mean = jnp.sum(y) * inv_n
            d = y - mean
            var = jnp.sum(d * d) * inv_n
            yn = d * lax.rsqrt(var + 1e-5) * w + b
            return 0.5 * yn * (1.0 + jnp.tanh(_GELU_C * (yn + 0.044715 * (yn * yn * yn))))

        # ---- block_1: depthwise 3x3 (replicate) -> 1x1 conv -> GN -> GELU -------
        a1 = dwconv3x3(x, dw1_ref[...])                                   # (Cin, HW)
        y1 = jnp.dot(pw1t_ref[...].astype(in_dt), a1.astype(in_dt),
                     preferred_element_type=jnp.float32) + vecs[:, 0:1]   # (Cout, HW)
        y1 = groupnorm_gelu(y1, vecs[:, 1:2], vecs[:, 2:3])

        # ---- block_2: depthwise 3x3 (replicate) -> 1x1 conv -> GN -> GELU -------
        a2 = dwconv3x3(y1, dw2_ref[...])                                  # (Cout, HW)
        y2 = jnp.dot(pw2t_ref[...].astype(in_dt), a2.astype(in_dt),
                     preferred_element_type=jnp.float32) + vecs[:, 3:4]
        y2 = groupnorm_gelu(y2, vecs[:, 4:5], vecs[:, 5:6])

        # ---- residual: 1x1 projection only when channels differ -----------------
        if has_projection:
            res = jnp.dot(projt_ref[...].astype(in_dt), x.astype(in_dt),
                          preferred_element_type=jnp.float32) + vecs[:, 6:7]
        else:
            res = x  # identity passthrough, no MXU pass

        out_ref[0] = res + y2  # (Cout, HW) lane-dense store

    return kernel


def xception_block(x_nchw, params, *, mxu_bf16=False):
    """XceptionBlock forward (downsample=False, normalisation='ln')."""
    x = jnp.asarray(x_nchw, jnp.float32)
    N, cin, H, W = x.shape
    HW = H * W
    cout = params["pw1_w"].shape[1]

    has_projection = params.get("proj_w") is not None
    if not has_projection:
        assert cin == cout, "identity residual requires channels_in == channels_out"

    f32 = lambda a: jnp.asarray(a, jnp.float32)
    colv = lambda v: f32(v).reshape(-1, 1)  # per-channel column vector (C, 1)

    # Packed weights (see kernel docs above).
    dw1 = jnp.concatenate([f32(params["dw1_w"]).reshape(9, cin).T,
                           colv(params["dw1_b"])], axis=1)               # (Cin, 10)
    dw2 = jnp.concatenate([f32(params["dw2_w"]).reshape(9, cout).T,
                           colv(params["dw2_b"])], axis=1)               # (Cout, 10)
    pw1t = f32(params["pw1_w"]).T                                        # (Cout, Cin)
    pw2t = f32(params["pw2_w"]).T                                        # (Cout, Cout)
    vecs = jnp.concatenate(
        [colv(params["pw1_b"]), colv(params["ln1_w"]), colv(params["ln1_b"]),
         colv(params["pw2_b"]), colv(params["ln2_w"]), colv(params["ln2_b"]),
         colv(params["proj_b"]) if has_projection
         else jnp.zeros((cout, 1), jnp.float32)],
        axis=1)                                                          # (Cout, 7)

    weights = [dw1, pw1t, dw2, pw2t, vecs]
    if has_projection:
        weights.append(f32(params["proj_w"]).T)                          # (Cout, Cin)

    # NCHW -> (N, C, H*W): contiguous reshape, no transpose; HW maps to lanes.
    x_flat = x.reshape(N, cin, HW)

    def wspec(a):
        zeros = (0,) * a.ndim
        return pl.BlockSpec(a.shape, lambda b, _z=zeros: _z)

    kernel = _make_kernel(H, W, has_projection, mxu_bf16)

    # Shape-aware VMEM budget: double-buffered in/out blocks + packed weights +
    # resident (C, HW) intermediates, capped below physical VMEM.
    weight_bytes = sum(int(w.size) * 4 for w in weights)
    interm_bytes = HW * (4 * cin + 10 * cout) * 4
    need = 2 * (cin * HW * 4) + 2 * (cout * HW * 4) + weight_bytes + interm_bytes
    try:
        cap = int(pltpu.get_tpu_info().vmem_capacity_bytes * 0.75)
    except Exception:  # pragma: no cover - fall back if info is unavailable
        cap = 100 << 20
    vmem_bytes = int(min(max(need + (2 << 20), 32 << 20), cap, 100 << 20))

    out_flat = pl.pallas_call(
        kernel,
        out_shape=jax.ShapeDtypeStruct((N, cout, HW), jnp.float32),
        grid=(N,),
        in_specs=[pl.BlockSpec((1, cin, HW), lambda b: (b, 0, 0))]
                 + [wspec(w) for w in weights],
        out_specs=pl.BlockSpec((1, cout, HW), lambda b: (b, 0, 0)),
        compiler_params=pltpu.CompilerParams(
            dimension_semantics=("parallel",),
            vmem_limit_bytes=vmem_bytes,
        ),
    )(x_flat, *weights)

    # (N, Cout, H*W) -> (N, Cout, H, W): pure reshape, already NCHW.
    return out_flat.reshape(N, cout, H, W)


def xception_block_ref(x_nchw, params):
    """Pure-JAX reference (uses the same tanh-GELU approximation as the kernel)."""
    x = jnp.asarray(x_nchw, jnp.float32)

    def dw3x3(y, w, b):
        H, W = y.shape[2], y.shape[3]
        yp = jnp.pad(y, ((0, 0), (0, 0), (1, 1), (1, 1)), mode="edge")
        out = jnp.zeros_like(y)
        for di in range(3):
            for dj in range(3):
                out = out + w[di, dj].reshape(1, -1, 1, 1) * yp[:, :, di:di + H, dj:dj + W]
        return out + b.reshape(1, -1, 1, 1)

    def pw(y, w, b):
        o = jnp.einsum("nchw,co->nohw", y, w, precision=lax.Precision.HIGHEST)
        return o + b.reshape(1, -1, 1, 1)

    def gn_gelu(y, w, b):
        mean = jnp.mean(y, axis=(1, 2, 3), keepdims=True)
        var = jnp.mean(jnp.square(y - mean), axis=(1, 2, 3), keepdims=True)
        y = (y - mean) * lax.rsqrt(var + 1e-5) * w.reshape(1, -1, 1, 1) + b.reshape(1, -1, 1, 1)
        return 0.5 * y * (1.0 + jnp.tanh(_GELU_C * (y + 0.044715 * y ** 3)))

    y = gn_gelu(pw(dw3x3(x, params["dw1_w"], params["dw1_b"]),
                   params["pw1_w"], params["pw1_b"]),
                params["ln1_w"], params["ln1_b"])
    y = gn_gelu(pw(dw3x3(y, params["dw2_w"], params["dw2_b"]),
                   params["pw2_w"], params["pw2_b"]),
                params["ln2_w"], params["ln2_b"])
    if params.get("proj_w") is not None:
        x = pw(x, params["proj_w"], params["proj_b"])
    return x + y


def make_params(key, cin, cout):
    """Deterministic synthetic parameters.

    PyTorch shapes -> stored layout:
      depthwise Conv2d weight (C,1,3,3)        -> (3,3,C)
      pointwise/proj Conv2d weight (Co,Ci,1,1) -> (Ci,Co)
      biases / GroupNorm affine (C,)           -> (1,C)
    """
    ks = jax.random.split(key, 14)
    n = lambda k, s: (jax.random.normal(k, s, jnp.float32) * 0.1)
    return {
        "dw1_w": n(ks[0], (3, 3, cin)),
        "dw1_b": n(ks[1], (1, cin)),
        "pw1_w": n(ks[2], (cin, cout)),
        "pw1_b": n(ks[3], (1, cout)),
        "ln1_w": 1.0 + n(ks[4], (1, cout)),
        "ln1_b": n(ks[5], (1, cout)),
        "dw2_w": n(ks[6], (3, 3, cout)),
        "dw2_b": n(ks[7], (1, cout)),
        "pw2_w": n(ks[8], (cout, cout)),
        "pw2_b": n(ks[9], (1, cout)),
        "ln2_w": 1.0 + n(ks[10], (1, cout)),
        "ln2_b": n(ks[11], (1, cout)),
        "proj_w": n(ks[12], (cin, cout)),
        "proj_b": n(ks[13], (1, cout)),
    }


if __name__ == "__main__":
    key = jax.random.PRNGKey(0)
    k1, k2, kx1, kx2 = jax.random.split(key, 4)

    # Case 1: channels_in != channels_out -> 1x1 residual projection in kernel.
    N, CIN, COUT, H, W = 2, 4, 8, 16, 16
    params = make_params(k1, CIN, COUT)
    x = jax.random.normal(kx1, (N, CIN, H, W), jnp.float32)
    out = jax.block_until_ready(jax.jit(xception_block)(x, params))
    ref = xception_block_ref(x, params)
    assert out.shape == (N, COUT, H, W), out.shape
    assert jnp.all(jnp.isfinite(out))
    assert jnp.allclose(out, ref, atol=1e-2, rtol=1e-2), \
        float(jnp.max(jnp.abs(out - ref)))

    # Case 2: channels_in == channels_out -> identity residual (no projection matmul).
    params_id = make_params(k2, COUT, COUT)
    params_id["proj_w"] = None
    params_id["proj_b"] = None
    x2 = jax.random.normal(kx2, (N, COUT, H, W), jnp.float32)
    out2 = jax.block_until_ready(jax.jit(xception_block)(x2, params_id))
    ref2 = xception_block_ref(x2, params_id)
    assert out2.shape == (N, COUT, H, W), out2.shape
    assert jnp.all(jnp.isfinite(out2))
    assert jnp.allclose(out2, ref2, atol=1e-2, rtol=1e-2), \
        float(jnp.max(jnp.abs(out2 - ref2)))

    print("KERNEL_OK")
</pallas_src>

<mosaic_0001>
module attributes {stable_mosaic.version = 11 : i64} {
  func.func @kernel(%arg0: i32, %arg1: memref<1x4x256xf32, #tpu.memory_space<vmem>>, %arg2: memref<4x10xf32, #tpu.memory_space<vmem>>, %arg3: memref<8x4xf32, #tpu.memory_space<vmem>>, %arg4: memref<8x10xf32, #tpu.memory_space<vmem>>, %arg5: memref<8x8xf32, #tpu.memory_space<vmem>>, %arg6: memref<8x7xf32, #tpu.memory_space<vmem>>, %arg7: memref<8x4xf32, #tpu.memory_space<vmem>>, %arg8: memref<1x8x256xf32, #tpu.memory_space<vmem>>) attributes {dimension_semantics = [#tpu.dimension_semantics<parallel>], iteration_bounds = array<i64: 2>, scalar_prefetch = 0 : i64, scratch_operands = 0 : i64, tpu.core_type = #tpu.core_type<tc>, window_params = [{transform_indices = @transform_0, window_bounds = array<i64: 1, 4, 256>}, {pipeline_mode = #tpu.pipeline_mode<synchronous>, transform_indices = @transform_1, window_bounds = array<i64: 4, 10>}, {pipeline_mode = #tpu.pipeline_mode<synchronous>, transform_indices = @transform_2, window_bounds = array<i64: 8, 4>}, {pipeline_mode = #tpu.pipeline_mode<synchronous>, transform_indices = @transform_3, window_bounds = array<i64: 8, 10>}, {pipeline_mode = #tpu.pipeline_mode<synchronous>, transform_indices = @transform_4, window_bounds = array<i64: 8, 8>}, {pipeline_mode = #tpu.pipeline_mode<synchronous>, transform_indices = @transform_5, window_bounds = array<i64: 8, 7>}, {pipeline_mode = #tpu.pipeline_mode<synchronous>, transform_indices = @transform_6, window_bounds = array<i64: 8, 4>}, {transform_indices = @transform_7, window_bounds = array<i64: 1, 8, 256>}]} {
    %c0 = arith.constant 0 : index
    %c0_0 = arith.constant 0 : index
    %c0_1 = arith.constant 0 : index
    %0 = vector.load %arg1[%c0, %c0_0, %c0_1] : memref<1x4x256xf32, #tpu.memory_space<vmem>>, vector<1x4x256xf32>
    %1 = vector.shape_cast %0 : vector<1x4x256xf32> to vector<4x256xf32>
    %c0_2 = arith.constant 0 : index
    %c0_3 = arith.constant 0 : index
    %2 = vector.load %arg6[%c0_2, %c0_3] : memref<8x7xf32, #tpu.memory_space<vmem>>, vector<8x7xf32>
    %3 = tpu.iota {dimensions = array<i32: 1>} : vector<1x256xi32>
    %c16_i32 = arith.constant 16 : i32
    %c0_i32 = arith.constant 0 : i32
    %4 = arith.cmpi eq, %c16_i32, %c0_i32 : i32
    %c1_i32 = arith.constant 1 : i32
    %5 = arith.select %4, %c1_i32, %c16_i32 : i32
    %6 = vector.broadcast %5 : i32 to vector<1x256xi32>
    %7 = arith.remsi %3, %6 : vector<1x256xi32>
    %c0_i32_4 = arith.constant 0 : i32
    %8 = vector.broadcast %c0_i32_4 : i32 to vector<1x256xi32>
    %9 = arith.cmpi ne, %7, %8 : vector<1x256xi32>
    %c0_i32_5 = arith.constant 0 : i32
    %10 = vector.broadcast %c0_i32_5 : i32 to vector<1x256xi32>
    %11 = arith.cmpi slt, %7, %10 : vector<1x256xi32>
    %c0_i32_6 = arith.constant 0 : i32
    %12 = arith.cmpi slt, %5, %c0_i32_6 : i32
    %13 = vector.broadcast %12 : i1 to vector<1x256xi1>
    %14 = vector.broadcast %13 : vector<1x256xi1> to vector<1x256xi1>
    %15 = arith.xori %11, %14 : vector<1x256xi1>
    %16 = arith.andi %15, %9 : vector<1x256xi1>
    %17 = vector.broadcast %5 : i32 to vector<1x256xi32>
    %18 = arith.addi %7, %17 : vector<1x256xi32>
    %19 = arith.select %16, %18, %7 : vector<1x256xi1>, vector<1x256xi32>
    %c0_i32_7 = arith.constant 0 : i32
    %20 = vector.broadcast %c0_i32_7 : i32 to vector<1x256xi32>
    %21 = arith.cmpi eq, %19, %20 : vector<1x256xi32>
    %c15_i32 = arith.constant 15 : i32
    %22 = vector.broadcast %c15_i32 : i32 to vector<1x256xi32>
    %23 = arith.cmpi eq, %19, %22 : vector<1x256xi32>
    %c16_i32_8 = arith.constant 16 : i32
    %24 = vector.broadcast %c16_i32_8 : i32 to vector<1x256xi32>
    %25 = arith.cmpi slt, %3, %24 : vector<1x256xi32>
    %c240_i32 = arith.constant 240 : i32
    %26 = vector.broadcast %c240_i32 : i32 to vector<1x256xi32>
    %27 = arith.cmpi sge, %3, %26 : vector<1x256xi32>
    %c0_9 = arith.constant 0 : index
    %c0_10 = arith.constant 0 : index
    %28 = vector.load %arg2[%c0_9, %c0_10] : memref<4x10xf32, #tpu.memory_space<vmem>>, vector<4x10xf32>
    %c1_i32_11 = arith.constant 1 : i32
    %29 = tpu.dynamic_rotate %1 by %c1_i32_11 dim 1 : vector<4x256xf32>, i32 -> vector<4x256xf32>
    %30 = vector.shape_cast %21 : vector<1x256xi1> to vector<1x256xi1>
    %31 = vector.broadcast %30 : vector<1x256xi1> to vector<4x256xi1>
    %32 = arith.select %31, %1, %29 : vector<4x256xi1>, vector<4x256xf32>
    %c255_i32 = arith.constant 255 : i32
    %33 = tpu.dynamic_rotate %1 by %c255_i32 dim 1 : vector<4x256xf32>, i32 -> vector<4x256xf32>
    %34 = vector.shape_cast %23 : vector<1x256xi1> to vector<1x256xi1>
    %35 = vector.broadcast %34 : vector<1x256xi1> to vector<4x256xi1>
    %36 = arith.select %35, %1, %33 : vector<4x256xi1>, vector<4x256xf32>
    %37 = vector.extract_strided_slice %28 {offsets = [0, 0], sizes = [4, 1], strides = [1, 1]} : vector<4x10xf32> to vector<4x1xf32>
    %38 = vector.broadcast %37 : vector<4x1xf32> to vector<4x256xf32>
    %39 = arith.mulf %32, %38 : vector<4x256xf32>
    %40 = vector.extract_strided_slice %28 {offsets = [0, 1], sizes = [4, 1], strides = [1, 1]} : vector<4x10xf32> to vector<4x1xf32>
    %41 = vector.broadcast %40 : vector<4x1xf32> to vector<4x256xf32>
    %42 = arith.mulf %1, %41 : vector<4x256xf32>
    %43 = arith.addf %39, %42 : vector<4x256xf32>
    %44 = vector.extract_strided_slice %28 {offsets = [0, 2], sizes = [4, 1], strides = [1, 1]} : vector<4x10xf32> to vector<4x1xf32>
    %45 = vector.broadcast %44 : vector<4x1xf32> to vector<4x256xf32>
    %46 = arith.mulf %36, %45 : vector<4x256xf32>
    %47 = arith.addf %43, %46 : vector<4x256xf32>
    %48 = vector.extract_strided_slice %28 {offsets = [0, 3], sizes = [4, 1], strides = [1, 1]} : vector<4x10xf32> to vector<4x1xf32>
    %49 = vector.broadcast %48 : vector<4x1xf32> to vector<4x256xf32>
    %50 = arith.mulf %32, %49 : vector<4x256xf32>
    %51 = vector.extract_strided_slice %28 {offsets = [0, 4], sizes = [4, 1], strides = [1, 1]} : vector<4x10xf32> to vector<4x1xf32>
    %52 = vector.broadcast %51 : vector<4x1xf32> to vector<4x256xf32>
    %53 = arith.mulf %1, %52 : vector<4x256xf32>
    %54 = arith.addf %50, %53 : vector<4x256xf32>
    %55 = vector.extract_strided_slice %28 {offsets = [0, 5], sizes = [4, 1], strides = [1, 1]} : vector<4x10xf32> to vector<4x1xf32>
    %56 = vector.broadcast %55 : vector<4x1xf32> to vector<4x256xf32>
    %57 = arith.mulf %36, %56 : vector<4x256xf32>
    %58 = arith.addf %54, %57 : vector<4x256xf32>
    %59 = vector.extract_strided_slice %28 {offsets = [0, 6], sizes = [4, 1], strides = [1, 1]} : vector<4x10xf32> to vector<4x1xf32>
    %60 = vector.broadcast %59 : vector<4x1xf32> to vector<4x256xf32>
    %61 = arith.mulf %32, %60 : vector<4x256xf32>
    %62 = vector.extract_strided_slice %28 {offsets = [0, 7], sizes = [4, 1], strides = [1, 1]} : vector<4x10xf32> to vector<4x1xf32>
    %63 = vector.broadcast %62 : vector<4x1xf32> to vector<4x256xf32>
    %64 = arith.mulf %1, %63 : vector<4x256xf32>
    %65 = arith.addf %61, %64 : vector<4x256xf32>
    %66 = vector.extract_strided_slice %28 {offsets = [0, 8], sizes = [4, 1], strides = [1, 1]} : vector<4x10xf32> to vector<4x1xf32>
    %67 = vector.broadcast %66 : vector<4x1xf32> to vector<4x256xf32>
    %68 = arith.mulf %36, %67 : vector<4x256xf32>
    %69 = arith.addf %65, %68 : vector<4x256xf32>
    %c16_i32_12 = arith.constant 16 : i32
    %70 = tpu.dynamic_rotate %47 by %c16_i32_12 dim 1 : vector<4x256xf32>, i32 -> vector<4x256xf32>
    %71 = vector.shape_cast %25 : vector<1x256xi1> to vector<1x256xi1>
    %72 = vector.broadcast %71 : vector<1x256xi1> to vector<4x256xi1>
    %73 = arith.select %72, %47, %70 : vector<4x256xi1>, vector<4x256xf32>
    %c240_i32_13 = arith.constant 240 : i32
    %74 = tpu.dynamic_rotate %69 by %c240_i32_13 dim 1 : vector<4x256xf32>, i32 -> vector<4x256xf32>
    %75 = vector.shape_cast %27 : vector<1x256xi1> to vector<1x256xi1>
    %76 = vector.broadcast %75 : vector<1x256xi1> to vector<4x256xi1>
    %77 = arith.select %76, %69, %74 : vector<4x256xi1>, vector<4x256xf32>
    %78 = arith.addf %73, %58 : vector<4x256xf32>
    %79 = arith.addf %78, %77 : vector<4x256xf32>
    %80 = vector.extract_strided_slice %28 {offsets = [0, 9], sizes = [4, 1], strides = [1, 1]} : vector<4x10xf32> to vector<4x1xf32>
    %81 = vector.broadcast %80 : vector<4x1xf32> to vector<4x256xf32>
    %82 = arith.addf %79, %81 : vector<4x256xf32>
    %c0_14 = arith.constant 0 : index
    %c0_15 = arith.constant 0 : index
    %83 = vector.load %arg3[%c0_14, %c0_15] : memref<8x4xf32, #tpu.memory_space<vmem>>, vector<8x4xf32>
    %cst = arith.constant dense<0.000000e+00> : vector<8x256xf32>
    %84 = tpu.matmul %83, %82, %cst {dimension_numbers = #tpu.dot_dimension_numbers<[1], [0], [0], [1], [0, 0, 1, 1], [], []>} : vector<8x4xf32>, vector<4x256xf32>, vector<8x256xf32> -> vector<8x256xf32>
    %85 = vector.extract_strided_slice %2 {offsets = [0, 0], sizes = [8, 1], strides = [1, 1]} : vector<8x7xf32> to vector<8x1xf32>
    %86 = vector.broadcast %85 : vector<8x1xf32> to vector<8x256xf32>
    %87 = arith.addf %84, %86 : vector<8x256xf32>
    %88 = vector.extract_strided_slice %2 {offsets = [0, 1], sizes = [8, 1], strides = [1, 1]} : vector<8x7xf32> to vector<8x1xf32>
    %89 = vector.extract_strided_slice %2 {offsets = [0, 2], sizes = [8, 1], strides = [1, 1]} : vector<8x7xf32> to vector<8x1xf32>
    %90 = vector.shape_cast %87 : vector<8x256xf32> to vector<1x8x256xf32>
    %cst_16 = arith.constant dense<0.000000e+00> : vector<1xf32>
    %91 = vector.multi_reduction <add>, %90, %cst_16 [1, 2] : vector<1x8x256xf32> to vector<1xf32>
    %92 = vector.shape_cast %91 : vector<1xf32> to vector<1x1x1xf32>
    %93 = vector.extract %92[0, 0, 0] : f32 from vector<1x1x1xf32>
    %cst_17 = arith.constant 4.8828125E-4 : f32
    %94 = arith.mulf %93, %cst_17 : f32
    %95 = vector.broadcast %94 : f32 to vector<8x256xf32>
    %96 = arith.subf %87, %95 : vector<8x256xf32>
    %97 = arith.mulf %96, %96 : vector<8x256xf32>
    %98 = vector.shape_cast %97 : vector<8x256xf32> to vector<1x8x256xf32>
    %cst_18 = arith.constant dense<0.000000e+00> : vector<1xf32>
    %99 = vector.multi_reduction <add>, %98, %cst_18 [1, 2] : vector<1x8x256xf32> to vector<1xf32>
    %100 = vector.shape_cast %99 : vector<1xf32> to vector<1x1x1xf32>
    %101 = vector.extract %100[0, 0, 0] : f32 from vector<1x1x1xf32>
    %cst_19 = arith.constant 4.8828125E-4 : f32
    %102 = arith.mulf %101, %cst_19 : f32
    %cst_20 = arith.constant 9.99999974E-6 : f32
    %103 = arith.addf %102, %cst_20 : f32
    %104 = math.rsqrt %103 : f32
    %105 = vector.broadcast %104 : f32 to vector<8x256xf32>
    %106 = arith.mulf %96, %105 : vector<8x256xf32>
    %107 = vector.broadcast %88 : vector<8x1xf32> to vector<8x256xf32>
    %108 = arith.mulf %106, %107 : vector<8x256xf32>
    %109 = vector.broadcast %89 : vector<8x1xf32> to vector<8x256xf32>
    %110 = arith.addf %108, %109 : vector<8x256xf32>
    %cst_21 = arith.constant 5.000000e-01 : f32
    %111 = vector.broadcast %cst_21 : f32 to vector<8x256xf32>
    %112 = arith.mulf %111, %110 : vector<8x256xf32>
    %113 = arith.mulf %110, %110 : vector<8x256xf32>
    %114 = arith.mulf %113, %110 : vector<8x256xf32>
    %cst_22 = arith.constant 4.471500e-02 : f32
    %115 = vector.broadcast %cst_22 : f32 to vector<8x256xf32>
    %116 = arith.mulf %115, %114 : vector<8x256xf32>
    %117 = arith.addf %110, %116 : vector<8x256xf32>
    %cst_23 = arith.constant 0.797884583 : f32
    %118 = vector.broadcast %cst_23 : f32 to vector<8x256xf32>
    %119 = arith.mulf %118, %117 : vector<8x256xf32>
    %120 = math.tanh %119 : vector<8x256xf32>
    %cst_24 = arith.constant 1.000000e+00 : f32
    %121 = vector.broadcast %cst_24 : f32 to vector<8x256xf32>
    %122 = arith.addf %121, %120 : vector<8x256xf32>
    %123 = arith.mulf %112, %122 : vector<8x256xf32>
    %c0_25 = arith.constant 0 : index
    %c0_26 = arith.constant 0 : index
    %124 = vector.load %arg4[%c0_25, %c0_26] : memref<8x10xf32, #tpu.memory_space<vmem>>, vector<8x10xf32>
    %c1_i32_27 = arith.constant 1 : i32
    %125 = tpu.dynamic_rotate %123 by %c1_i32_27 dim 1 : vector<8x256xf32>, i32 -> vector<8x256xf32>
    %126 = vector.shape_cast %21 : vector<1x256xi1> to vector<1x256xi1>
    %127 = vector.broadcast %126 : vector<1x256xi1> to vector<8x256xi1>
    %128 = arith.select %127, %123, %125 : vector<8x256xi1>, vector<8x256xf32>
    %c255_i32_28 = arith.constant 255 : i32
    %129 = tpu.dynamic_rotate %123 by %c255_i32_28 dim 1 : vector<8x256xf32>, i32 -> vector<8x256xf32>
    %130 = vector.shape_cast %23 : vector<1x256xi1> to vector<1x256xi1>
    %131 = vector.broadcast %130 : vector<1x256xi1> to vector<8x256xi1>
    %132 = arith.select %131, %123, %129 : vector<8x256xi1>, vector<8x256xf32>
    %133 = vector.extract_strided_slice %124 {offsets = [0, 0], sizes = [8, 1], strides = [1, 1]} : vector<8x10xf32> to vector<8x1xf32>
    %134 = vector.broadcast %133 : vector<8x1xf32> to vector<8x256xf32>
    %135 = arith.mulf %128, %134 : vector<8x256xf32>
    %136 = vector.extract_strided_slice %124 {offsets = [0, 1], sizes = [8, 1], strides = [1, 1]} : vector<8x10xf32> to vector<8x1xf32>
    %137 = vector.broadcast %136 : vector<8x1xf32> to vector<8x256xf32>
    %138 = arith.mulf %123, %137 : vector<8x256xf32>
    %139 = arith.addf %135, %138 : vector<8x256xf32>
    %140 = vector.extract_strided_slice %124 {offsets = [0, 2], sizes = [8, 1], strides = [1, 1]} : vector<8x10xf32> to vector<8x1xf32>
    %141 = vector.broadcast %140 : vector<8x1xf32> to vector<8x256xf32>
    %142 = arith.mulf %132, %141 : vector<8x256xf32>
    %143 = arith.addf %139, %142 : vector<8x256xf32>
    %144 = vector.extract_strided_slice %124 {offsets = [0, 3], sizes = [8, 1], strides = [1, 1]} : vector<8x10xf32> to vector<8x1xf32>
    %145 = vector.broadcast %144 : vector<8x1xf32> to vector<8x256xf32>
    %146 = arith.mulf %128, %145 : vector<8x256xf32>
    %147 = vector.extract_strided_slice %124 {offsets = [0, 4], sizes = [8, 1], strides = [1, 1]} : vector<8x10xf32> to vector<8x1xf32>
    %148 = vector.broadcast %147 : vector<8x1xf32> to vector<8x256xf32>
    %149 = arith.mulf %123, %148 : vector<8x256xf32>
    %150 = arith.addf %146, %149 : vector<8x256xf32>
    %151 = vector.extract_strided_slice %124 {offsets = [0, 5], sizes = [8, 1], strides = [1, 1]} : vector<8x10xf32> to vector<8x1xf32>
    %152 = vector.broadcast %151 : vector<8x1xf32> to vector<8x256xf32>
    %153 = arith.mulf %132, %152 : vector<8x256xf32>
    %154 = arith.addf %150, %153 : vector<8x256xf32>
    %155 = vector.extract_strided_slice %124 {offsets = [0, 6], sizes = [8, 1], strides = [1, 1]} : vector<8x10xf32> to vector<8x1xf32>
    %156 = vector.broadcast %155 : vector<8x1xf32> to vector<8x256xf32>
    %157 = arith.mulf %128, %156 : vector<8x256xf32>
    %158 = vector.extract_strided_slice %124 {offsets = [0, 7], sizes = [8, 1], strides = [1, 1]} : vector<8x10xf32> to vector<8x1xf32>
    %159 = vector.broadcast %158 : vector<8x1xf32> to vector<8x256xf32>
    %160 = arith.mulf %123, %159 : vector<8x256xf32>
    %161 = arith.addf %157, %160 : vector<8x256xf32>
    %162 = vector.extract_strided_slice %124 {offsets = [0, 8], sizes = [8, 1], strides = [1, 1]} : vector<8x10xf32> to vector<8x1xf32>
    %163 = vector.broadcast %162 : vector<8x1xf32> to vector<8x256xf32>
    %164 = arith.mulf %132, %163 : vector<8x256xf32>
    %165 = arith.addf %161, %164 : vector<8x256xf32>
    %c16_i32_29 = arith.constant 16 : i32
    %166 = tpu.dynamic_rotate %143 by %c16_i32_29 dim 1 : vector<8x256xf32>, i32 -> vector<8x256xf32>
    %167 = vector.shape_cast %25 : vector<1x256xi1> to vector<1x256xi1>
    %168 = vector.broadcast %167 : vector<1x256xi1> to vector<8x256xi1>
    %169 = arith.select %168, %143, %166 : vector<8x256xi1>, vector<8x256xf32>
    %c240_i32_30 = arith.constant 240 : i32
    %170 = tpu.dynamic_rotate %165 by %c240_i32_30 dim 1 : vector<8x256xf32>, i32 -> vector<8x256xf32>
    %171 = vector.shape_cast %27 : vector<1x256xi1> to vector<1x256xi1>
    %172 = vector.broadcast %171 : vector<1x256xi1> to vector<8x256xi1>
    %173 = arith.select %172, %165, %170 : vector<8x256xi1>, vector<8x256xf32>
    %174 = arith.addf %169, %154 : vector<8x256xf32>
    %175 = arith.addf %174, %173 : vector<8x256xf32>
    %176 = vector.extract_strided_slice %124 {offsets = [0, 9], sizes = [8, 1], strides = [1, 1]} : vector<8x10xf32> to vector<8x1xf32>
    %177 = vector.broadcast %176 : vector<8x1xf32> to vector<8x256xf32>
    %178 = arith.addf %175, %177 : vector<8x256xf32>
    %c0_31 = arith.constant 0 : index
    %c0_32 = arith.constant 0 : index
    %179 = vector.load %arg5[%c0_31, %c0_32] : memref<8x8xf32, #tpu.memory_space<vmem>>, vector<8x8xf32>
    %cst_33 = arith.constant dense<0.000000e+00> : vector<8x256xf32>
    %180 = tpu.matmul %179, %178, %cst_33 {dimension_numbers = #tpu.dot_dimension_numbers<[1], [0], [0], [1], [0, 0, 1, 1], [], []>} : vector<8x8xf32>, vector<8x256xf32>, vector<8x256xf32> -> vector<8x256xf32>
    %181 = vector.extract_strided_slice %2 {offsets = [0, 3], sizes = [8, 1], strides = [1, 1]} : vector<8x7xf32> to vector<8x1xf32>
    %182 = vector.broadcast %181 : vector<8x1xf32> to vector<8x256xf32>
    %183 = arith.addf %180, %182 : vector<8x256xf32>
    %184 = vector.extract_strided_slice %2 {offsets = [0, 4], sizes = [8, 1], strides = [1, 1]} : vector<8x7xf32> to vector<8x1xf32>
    %185 = vector.extract_strided_slice %2 {offsets = [0, 5], sizes = [8, 1], strides = [1, 1]} : vector<8x7xf32> to vector<8x1xf32>
    %186 = vector.shape_cast %183 : vector<8x256xf32> to vector<1x8x256xf32>
    %cst_34 = arith.constant dense<0.000000e+00> : vector<1xf32>
    %187 = vector.multi_reduction <add>, %186, %cst_34 [1, 2] : vector<1x8x256xf32> to vector<1xf32>
    %188 = vector.shape_cast %187 : vector<1xf32> to vector<1x1x1xf32>
    %189 = vector.extract %188[0, 0, 0] : f32 from vector<1x1x1xf32>
    %cst_35 = arith.constant 4.8828125E-4 : f32
    %190 = arith.mulf %189, %cst_35 : f32
    %191 = vector.broadcast %190 : f32 to vector<8x256xf32>
    %192 = arith.subf %183, %191 : vector<8x256xf32>
    %193 = arith.mulf %192, %192 : vector<8x256xf32>
    %194 = vector.shape_cast %193 : vector<8x256xf32> to vector<1x8x256xf32>
    %cst_36 = arith.constant dense<0.000000e+00> : vector<1xf32>
    %195 = vector.multi_reduction <add>, %194, %cst_36 [1, 2] : vector<1x8x256xf32> to vector<1xf32>
    %196 = vector.shape_cast %195 : vector<1xf32> to vector<1x1x1xf32>
    %197 = vector.extract %196[0, 0, 0] : f32 from vector<1x1x1xf32>
    %cst_37 = arith.constant 4.8828125E-4 : f32
    %198 = arith.mulf %197, %cst_37 : f32
    %cst_38 = arith.constant 9.99999974E-6 : f32
    %199 = arith.addf %198, %cst_38 : f32
    %200 = math.rsqrt %199 : f32
    %201 = vector.broadcast %200 : f32 to vector<8x256xf32>
    %202 = arith.mulf %192, %201 : vector<8x256xf32>
    %203 = vector.broadcast %184 : vector<8x1xf32> to vector<8x256xf32>
    %204 = arith.mulf %202, %203 : vector<8x256xf32>
    %205 = vector.broadcast %185 : vector<8x1xf32> to vector<8x256xf32>
    %206 = arith.addf %204, %205 : vector<8x256xf32>
    %cst_39 = arith.constant 5.000000e-01 : f32
    %207 = vector.broadcast %cst_39 : f32 to vector<8x256xf32>
    %208 = arith.mulf %207, %206 : vector<8x256xf32>
    %209 = arith.mulf %206, %206 : vector<8x256xf32>
    %210 = arith.mulf %209, %206 : vector<8x256xf32>
    %cst_40 = arith.constant 4.471500e-02 : f32
    %211 = vector.broadcast %cst_40 : f32 to vector<8x256xf32>
    %212 = arith.mulf %211, %210 : vector<8x256xf32>
    %213 = arith.addf %206, %212 : vector<8x256xf32>
    %cst_41 = arith.constant 0.797884583 : f32
    %214 = vector.broadcast %cst_41 : f32 to vector<8x256xf32>
    %215 = arith.mulf %214, %213 : vector<8x256xf32>
    %216 = math.tanh %215 : vector<8x256xf32>
    %cst_42 = arith.constant 1.000000e+00 : f32
    %217 = vector.broadcast %cst_42 : f32 to vector<8x256xf32>
    %218 = arith.addf %217, %216 : vector<8x256xf32>
    %219 = arith.mulf %208, %218 : vector<8x256xf32>
    %c0_43 = arith.constant 0 : index
    %c0_44 = arith.constant 0 : index
    %220 = vector.load %arg7[%c0_43, %c0_44] : memref<8x4xf32, #tpu.memory_space<vmem>>, vector<8x4xf32>
    %cst_45 = arith.constant dense<0.000000e+00> : vector<8x256xf32>
    %221 = tpu.matmul %220, %1, %cst_45 {dimension_numbers = #tpu.dot_dimension_numbers<[1], [0], [0], [1], [0, 0, 1, 1], [], []>} : vector<8x4xf32>, vector<4x256xf32>, vector<8x256xf32> -> vector<8x256xf32>
    %222 = vector.extract_strided_slice %2 {offsets = [0, 6], sizes = [8, 1], strides = [1, 1]} : vector<8x7xf32> to vector<8x1xf32>
    %223 = vector.broadcast %222 : vector<8x1xf32> to vector<8x256xf32>
    %224 = arith.addf %221, %223 : vector<8x256xf32>
    %225 = arith.addf %224, %219 : vector<8x256xf32>
    %c0_46 = arith.constant 0 : index
    %c0_47 = arith.constant 0 : index
    %c0_48 = arith.constant 0 : index
    %226 = vector.load %arg8[%c0_46, %c0_47, %c0_48] : memref<1x8x256xf32, #tpu.memory_space<vmem>>, vector<1x8x256xf32>
    %227 = vector.shape_cast %226 : vector<1x8x256xf32> to vector<8x256xf32>
    %228 = vector.shape_cast %225 : vector<8x256xf32> to vector<1x8x256xf32>
    tpu.vector_store %arg8[%c0_46, %c0_47, %c0_48], %228 {strides = array<i32>} : memref<1x8x256xf32, #tpu.memory_space<vmem>>, vector<1x8x256xf32>,
    return
  }
  func.func @transform_0(%arg0: i32) -> (i32, i32, i32) {
    %c0_i32 = arith.constant 0 : i32
    %c0_i32_0 = arith.constant 0 : i32
    %c0_i32_1 = arith.constant 0 : i32
    return %arg0, %c0_i32, %c0_i32_0 : i32, i32, i32
  }
  func.func @transform_1(%arg0: i32) -> (i32, i32) {
    %c0_i32 = arith.constant 0 : i32
    %c0_i32_0 = arith.constant 0 : i32
    %c0_i32_1 = arith.constant 0 : i32
    return %c0_i32, %c0_i32_0 : i32, i32
  }
  func.func @transform_2(%arg0: i32) -> (i32, i32) {
    %c0_i32 = arith.constant 0 : i32
    %c0_i32_0 = arith.constant 0 : i32
    %c0_i32_1 = arith.constant 0 : i32
    return %c0_i32, %c0_i32_0 : i32, i32
  }
  func.func @transform_3(%arg0: i32) -> (i32, i32) {
    %c0_i32 = arith.constant 0 : i32
    %c0_i32_0 = arith.constant 0 : i32
    %c0_i32_1 = arith.constant 0 : i32
    return %c0_i32, %c0_i32_0 : i32, i32
  }
  func.func @transform_4(%arg0: i32) -> (i32, i32) {
    %c0_i32 = arith.constant 0 : i32
    %c0_i32_0 = arith.constant 0 : i32
    %c0_i32_1 = arith.constant 0 : i32
    return %c0_i32, %c0_i32_0 : i32, i32
  }
  func.func @transform_5(%arg0: i32) -> (i32, i32) {
    %c0_i32 = arith.constant 0 : i32
    %c0_i32_0 = arith.constant 0 : i32
    %c0_i32_1 = arith.constant 0 : i32
    return %c0_i32, %c0_i32_0 : i32, i32
  }
  func.func @transform_6(%arg0: i32) -> (i32, i32) {
    %c0_i32 = arith.constant 0 : i32
    %c0_i32_0 = arith.constant 0 : i32
    %c0_i32_1 = arith.constant 0 : i32
    return %c0_i32, %c0_i32_0 : i32, i32
  }
  func.func @transform_7(%arg0: i32) -> (i32, i32, i32) {
    %c0_i32 = arith.constant 0 : i32
    %c0_i32_0 = arith.constant 0 : i32
    %c0_i32_1 = arith.constant 0 : i32
    return %arg0, %c0_i32, %c0_i32_0 : i32, i32, i32
  }
}

</mosaic_0001>

<bundles_post_ra>
// kernel: xception_block.1
= control target key start
LH: loop header
LB: loop body
LE: loop exit
PB: predicated region body
PF: predicated region fallthrough
CT: control target
= control target key end

     0   :  { %s1184_s24 = smov 0   ;;  %s1393_s0 = inlined_call_operand.vmem [shape: f32[2,4,256], index: 0, kind: input, shape index: {}]   ;;  %s1394_s1 = inlined_call_operand.vmem [shape: f32[4,10], index: 1, kind: input, shape index: {}]   ;;  %s1395_s2 = inlined_call_operand.vmem [shape: f32[8,4], index: 2, kind: input, shape index: {}]   ;;  %s1396_s3 = inlined_call_operand.vmem [shape: f32[8,10], index: 3, kind: input, shape index: {}]   ;;  %s1397_s4 = inlined_call_operand.vmem [shape: f32[8,8], index: 4, kind: input, shape index: {}]   ;;  %s1398_s5 = inlined_call_operand.vmem [shape: f32[8,7], index: 5, kind: input, shape index: {}]   ;;  %s1399_s6 = inlined_call_operand.vmem [shape: f32[8,4], index: 6, kind: input, shape index: {}]   ;;  %s1400_s7 = inlined_call_operand.vmem [shape: f32[2,8,256], index: 7, kind: output, shape index: {}]  }
   0x1 LB: > { %s1023_s25 = sadd.s32 4294967295, %s1126_s24   ;;  %p1027_p0 = scmp.ge.s32.totalorder %s1126_s24, 1  ;;  %s1126_s24 = sphi %s1184_s24, %s17_s24  }
   0x2   : > { %p237_p1 = scmp.lt.s32.totalorder %s1126_s24, 3 }
   0x4   : > { %p238_p2 = pnand %p1027_p0, %p237_p1 }
   0x5   : > { %v316_v0 = vld [vmem:[%s1394_s1] sm:$0xf] (!%p238_p2)  ;;  %v1128_v1 = vmov (!%p238_p2), 0   ;;  %v1129_v2 = vmov (!%p238_p2), 1   ;;  %p269_p3 = scmp.lt.s32.totalorder (!%p238_p2), %s1023_s25, 1  ;;  %v1130_v3 = vmov (!%p238_p2), 6   ;;  %v281_v15 = vlaneseq (!%p238_p2) }
   0x6   : > { %241 = sbr.rel (%p238_p2) target bundleno = 2022 (0x7e6), region = 48  ;;  %1081 = vset.pattern.permute.xlu1 (!%p238_p2), %v1128_v1  ;;  %1079 = vset.pattern.permute.xlu0 (!%p238_p2), %v1129_v2  ;;  %v1131_v4 = vmov (!%p238_p2), 7   ;;  %v1132_v5 = vmov (!%p238_p2), 2   ;;  %v1133_v6 = vmov (!%p238_p2), 8   ;;  %s1134_s9 = smov (!%p238_p2), 1   ;;  %v1136_v9 = vmov (!%p238_p2), 4  }
   0x7   : > { %348 = vperm.xlu1 (!%p238_p2), %1081, %v316_v0   ;;  %354 = vperm.xlu0 (!%p238_p2), %1079, %v316_v0   ;;  %s1135_s10 = smov (!%p238_p2), 127   ;;  %v1137_v10 = vmov (!%p238_p2), 3   ;;  %v1138_v11 = vmov (!%p238_p2), 9   ;;  %v1139_v12 = vmov (!%p238_p2), 5   ;;  %v1140_v18 = vmov (!%p238_p2), 839922192  }
   0x8   : > { %v357_v19 = vunpack.c.l.s4 (!%p238_p2), %v1140_v18  ;;  %v1227_v20 = vand.u32 (!%p238_p2), 127, %v281_v15  ;;  %v360_v22 = vshrl.u32 (!%p238_p2), %v281_v15, 7  ;;  %s1141_s11 = smov (!%p238_p2), 112   ;;  %s1142_s12 = smov (!%p238_p2), 16   ;;  %vm485_vm9 = vcmask (!%p238_p2), 1043456  }
   0x9   : > { %vm481_vm10 = vcmask (!%p238_p2), 31744   ;;  %vm742_vm11 = vcmask (!%p238_p2), 64512  }
   0xa   : > { %v358_v21 = vunpack.c.0.s8 (!%p238_p2), %v357_v19  ;;  %v1230_v25 = vadd.s32 (!%p238_p2), 128, %v1227_v20  ;;  %v288_v26 = vand.u32 (!%p238_p2), 15, %v1227_v20  ;;  %vm324_vm0 = vcmp.lt.s32.totalorder (!%p238_p2), %v1227_v20, 1 }
   0xb   : > { %1082 = vset.pattern.permute.xlu1 (!%p238_p2), %v1130_v3  ;;  %1080 = vset.pattern.permute.xlu0 (!%p238_p2), %v1131_v4  ;;  %vm337_vm4 = vcmp.lt.s32.totalorder (!%p238_p2), %v1227_v20, 127  ;;  %vm312_vm6 = vcmp.lt.s32.totalorder (!%p238_p2), %v1227_v20, 16  ;;  %vm456_vm7 = vcmp.lt.s32.totalorder (!%p238_p2), %v1227_v20, 112 }
   0xc   : > { %410 = vperm.xlu1 (!%p238_p2), %1082, %v316_v0   ;;  %416 = vperm.xlu0 (!%p238_p2), %1080, %v316_v0   ;;  %v361_v27 = vsub.s32 (!%p238_p2), %v358_v21, %v360_v22  ;;  %v295_v30 = vand.u32 (!%p238_p2), 15, %v1230_v25  ;;  %vm1235_vm1 = vcmp.eq.s32.totalorder (!%p238_p2), %v288_v26, 0  ;;  %vm1247_vm3 = vcmp.eq.s32.totalorder (!%p238_p2), %v288_v26, 15 }
   0xd   : > { %s1410_s25 = smov (!%p269_p3, %s1023_s25), 1  ;;  %vm315_vm8 = vcmp.ge.s32.totalorder %v1230_v25, 240  ;;  %v881_v25 = vld [vmem:[%s1399_s6] sm:$0xff] }
   0xe   : > { %s1041_s28 = sshll.u32 %s1410_s25, 3  ;;  %vm1239_vm2 = vcmp.eq.s32.totalorder %v295_v30, 0  ;;  %vm1255_vm5 = vcmp.eq.s32.totalorder %v295_v30, 15  ;;  %s1042_s14 = sshll.u32 %s1410_s25, 4 }
   0xf   : > { %s273_s8 = scalar_lea.vmem %s1393_s0, %s1041_s28 }
  0x10   : > { %1083 = vset.pattern.permute.xlu1 %v1132_v5  ;;  %1084 = vset.pattern.permute.xlu0 %v1133_v6  ;;  %v1207_v7 = vld [vmem:[%s273_s8] sm:$0xff] }
  0x11   : > { %371 = vperm.xlu1 %1083, %v316_v0   ;;  %433 = vperm.xlu0 %1084, %v316_v0   ;;  %v1215_v8 = vcombine.high %v1207_v7, %v1207_v7 }
  0x15   : > { %320 = vrot.lane.b32.xlu1 %v1207_v7, %s1134_s9  ;;  %333 = vrot.lane.b32.xlu0 %v1207_v7, %s1135_s10 }
  0x16   : > { %1085 = vset.pattern.permute.xlu0 %v1136_v9  ;;  %1086 = vset.pattern.permute.xlu1 %v1137_v10 }
  0x19   : > { %322 = vrot.lane.b32.xlu1 %v1215_v8, %s1134_s9  ;;  %385 = vperm.xlu0 %1085, %v316_v0  }
  0x1d   : > { %335 = vrot.lane.b32.xlu1 %v1215_v8, %s1135_s10  ;;  %1088 = vset.pattern.permute.xlu0 %v1138_v11 }
  0x1e   : > { %470 = vperm.xlu0 %1088, %v316_v0  }
  0x21   : > { %379 = vperm.xlu1 %1086, %v316_v0  }
  0x22   : > { %1089 = vset.pattern.permute.xlu0 %v1128_v1 }
  0x25   : > { %1087 = vset.pattern.permute.xlu1 %v1139_v12 }
  0x26   : > { %402 = vperm.xlu1 %1087, %v316_v0  }
  0x2a   : > { %1090 = vset.pattern.permute.xlu1 %v1129_v2 }
  0x86   : > { %v349_v13 = vpop.permute.xlu1 %348  ;;  %v355_v14 = vpop.permute.xlu0 %354 }
  0x87   : > { %v362_v32 = vrot.slane %v355_v14, %v361_v27 }
  0x89   : > { %v364_v47 = vmul.f32 %v362_v32, %v1207_v7 }
  0x8b   : > { %v411_v16 = vpop.permute.xlu1 %410  ;;  %v417_v17 = vpop.permute.xlu0 %416  ;;  %v366_v60 = vcombine.high %v364_v47, %v364_v47 }
  0x8c   : > { %v424_v36 = vrot.slane %v417_v17, %v361_v27 }
  0x8e   : > { %v426_v49 = vmul.f32 %v424_v36, %v1207_v7 }
  0x90   : > { %v372_v23 = vpop.permute.xlu1 %371  ;;  %v434_v24 = vpop.permute.xlu0 %433  ;;  %v428_v21 = vcombine.high %v426_v49, %v426_v49 }
  0x94   : > { %v321_v28 = vpop.permute.xlu1 %320  ;;  %v334_v29 = vpop.permute.xlu0 %333 }
  0x98   : > { %v323_v33 = vpop.permute.xlu1 %322  ;;  %v386_v34 = vpop.permute.xlu0 %385 }
  0x99   : > { %v325_v37 = vsel %vm324_vm0, %v321_v28, %v323_v33  ;;  %v326_v38 = vsel %vm324_vm0, %v323_v33, %v321_v28  ;;  %v393_v39 = vrot.slane %v386_v34, %v361_v27 }
  0x9a   : > { %v331_v41 = vsel %vm1235_vm1, %v1207_v7, %v326_v38  ;;  %v332_v44 = vsel %vm1239_vm2, %v1215_v8, %v325_v37 }
  0x9b   : > { %v395_v43 = vmul.f32 %v393_v39, %v1207_v7  ;;  %v351_v45 = vmul.f32 %v349_v13, %v331_v41  ;;  %v413_v46 = vmul.f32 %v411_v16, %v331_v41  ;;  %v352_v54 = vmul.f32 %v349_v13, %v332_v44 }
  0x9c   : > { %v336_v48 = vpop.permute.xlu1 %335  ;;  %v414_v17 = vmul.f32 %v411_v16, %v332_v44  ;;  %v1280_v16 = vld [vmem:[%s1398_s5] sm:$0xff] }
  0x9d   : > { %v338_v50 = vsel %vm337_vm4, %v334_v29, %v336_v48  ;;  %v339_v51 = vsel %vm337_vm4, %v336_v48, %v334_v29  ;;  %v397_v52 = vcombine.high %v395_v43, %v395_v43  ;;  %v430_v56 = vadd.f32 %v426_v49, %v413_v46  ;;  %v471_v36 = vpop.permute.xlu0 %470 }
  0x9e   : > { %v344_v53 = vsel %vm1247_vm3, %v1207_v7, %v338_v50  ;;  %v345_v55 = vsel %vm1255_vm5, %v1215_v8, %v339_v51  ;;  %v368_v58 = vadd.f32 %v364_v47, %v351_v45  ;;  %v369_v13 = vadd.f32 %v366_v60, %v352_v54  ;;  %v475_v54 = vld [vmem:[%s1395_s2] sm:$0xff] }
  0x9f   : > { %v436_v57 = vmul.f32 %v434_v24, %v344_v53  ;;  %v374_v59 = vmul.f32 %v372_v23, %v344_v53  ;;  %v375_v62 = vmul.f32 %v372_v23, %v345_v55  ;;  %v437_v27 = vmul.f32 %v434_v24, %v345_v55 }
  0xa0   : > { %v380_v61 = vpop.permute.xlu1 %379  ;;  %v1143_v29 = vmov 0.0   ;;  %v431_v30 = vadd.f32 %v428_v21, %v414_v17 }
  0xa1   : > { %v382_v63 = vmul.f32 %v380_v61, %v331_v41  ;;  %v383_v0 = vmul.f32 %v380_v61, %v332_v44  ;;  %v438_v14 = vadd.f32 %v436_v57, %v430_v56  ;;  %v376_v15 = vadd.f32 %v374_v59, %v368_v58  ;;  %556 = vmatprep.mubr.f32.mxu0 %v1143_v29 }
  0xa2   : > { %v377_v26 = vadd.f32 %v375_v62, %v369_v13  ;;  %810 = vmatprep.mubr.f32.mxu1 %v1143_v29  ;;  %v439_v34 = vadd.f32 %v437_v27, %v431_v30 }
  0xa3   : > { %v399_v18 = vadd.f32 %v395_v43, %v382_v63  ;;  %v400_v19 = vadd.f32 %v397_v52, %v383_v0  ;;  %452 = vrot.lane.b32.xlu0 %v438_v14, %s1141_s11  ;;  %440 = vrot.lane.b32.xlu1 %v376_v15, %s1142_s12 }
  0xa5   : > { %v403_v22 = vpop.permute.xlu1 %402 }
  0xa6   : > { %v405_v28 = vmul.f32 %v403_v22, %v344_v53  ;;  %v406_v23 = vmul.f32 %v403_v22, %v345_v55 }
  0xa7   : > { %442 = vrot.lane.b32.xlu1 %v377_v26, %s1142_s12  ;;  %478 = vperm.xlu0 %1089, %v1280_v16  }
  0xa8   : > { %v407_v32 = vadd.f32 %v405_v28, %v399_v18  ;;  %v408_v33 = vadd.f32 %v406_v23, %v400_v19 }
  0xab   : > { %454 = vrot.lane.b32.xlu1 %v439_v34, %s1141_s11  ;;  %1091 = vset.pattern.permute.xlu0 %v1132_v5 }
 0x115   : > { %v441_v24 = vpop.permute.xlu1 %440  ;;  %v453_v44 = vpop.permute.xlu0 %452 }
 0x119   : > { %v443_v37 = vpop.permute.xlu1 %442 }
 0x11a   : > { %v445_v38 = vsel %vm312_vm6, %v443_v37, %v441_v24  ;;  %v444_v39 = vsel %vm312_vm6, %v441_v24, %v443_v37 }
 0x11b   : > { %v450_v41 = vsel %vm312_vm6, %v376_v15, %v445_v38  ;;  %v466_v46 = vadd.f32 %v444_v39, %v408_v33 }
 0x11c   : > { %v465_v43 = vadd.f32 %v450_v41, %v407_v32 }
 0x11d   : > { %v455_v45 = vpop.permute.xlu1 %454 }
 0x11e   : > { %v457_v47 = vsel %vm456_vm7, %v453_v44, %v455_v45  ;;  %v458_v48 = vsel %vm456_vm7, %v455_v45, %v453_v44 }
 0x11f   : > { %v464_v49 = vsel %vm315_vm8, %v439_v34, %v458_v48  ;;  %v467_v50 = vadd.f32 %v465_v43, %v457_v47 }
 0x120   : > { %v468_v51 = vadd.f32 %v466_v46, %v464_v49 }
 0x121   : > { %v473_v53 = vadd.f32 %v471_v36, %v467_v50 }
 0x122   : > { %v474_v52 = vadd.f32 %v471_v36, %v468_v51 }
 0x124   : > { %1032 = vmatprep.subr.msk.mxu0 %vm485_vm9, %v474_v52 }
 0x125   : > { %1033 = vmatpush1.msk.msra.mxu0 %vm485_vm9, %v473_v53 }
 0x126   : > { %1034 = vmatmul.mubr.msk.f32.vlgmr.msra.gmra.mrb[0].mxu0 %vm481_vm10, %v475_v54  ;;  %1036 = vmatprep.subr.msk.mxu0 %vm485_vm9, %v1215_v8  ;;  %v479_v55 = vpop.permute.xlu0 %478 }
 0x127   : > { %1037 = vmatpush1.msk.msra.mxu0 %vm485_vm9, %v1207_v7  ;;  %957 = vmatprep.mubr.f32.mxu0 %v1143_v29 }
 0x12a   : > { %1038 = vmatmul.mubr.msk.f32.vlgmr.msra.gmra.mrb[2].mxu0 %vm481_vm10, %v881_v25 }
 0x1f9   : > { %v558_v56 = vpop.f32.mrb[0].mxu0 }
 0x1fa   : > { %v559_v57 = vadd.f32 %v558_v56, %v479_v55  ;;  %v560_v58 = vpop.f32.mrb[1].mxu0 }
 0x1fb   : > { %v561_v59 = vadd.f32 %v560_v58, %v479_v55 }
 0x1fd   : > { %v563_v60 = vadd.f32 %v561_v59, %v559_v57 }
 0x1ff   : > { %564 = vadd.xlane.f32.xlu1 %v563_v60 }
 0x210   : > { %598 = vperm.xlu1 %1090, %v1280_v16  }
 0x214   : > { %1092 = vset.pattern.permute.xlu1 %v1128_v1  ;;  %v1313_v1 = vld [vmem:[%s1396_s3] sm:$0xff] }
 0x215   : > { %646 = vperm.xlu1 %1092, %v1313_v1  }
 0x219   : > { %1093 = vset.pattern.permute.xlu1 %v1129_v2 }
 0x21a   : > { %652 = vperm.xlu1 %1093, %v1313_v1  }
 0x21e   : > { %1094 = vset.pattern.permute.xlu1 %v1130_v3 }
 0x21f   : > { %690 = vperm.xlu1 %1094, %v1313_v1  }
 0x223   : > { %1095 = vset.pattern.permute.xlu1 %v1131_v4 }
 0x224   : > { %696 = vperm.xlu1 %1095, %v1313_v1  }
 0x228   : > { %1096 = vset.pattern.permute.xlu1 %v1132_v5 }
 0x229   : > { %660 = vperm.xlu1 %1096, %v1313_v1  }
 0x22d   : > { %1097 = vset.pattern.permute.xlu1 %v1133_v6 }
 0x22e   : > { %704 = vperm.xlu1 %1097, %v1313_v1  }
 0x232   : > { %1099 = vset.pattern.permute.xlu1 %v1136_v9 }
 0x28c   : > { %v565_v61 = vpop.xlane.xlu1 %564 }
 0x28d   : > { %v566_v62 = vrot.slane %v565_v61, 4 }
 0x28f   : > { %v567_v63 = vadd.f32 %v566_v62, %v565_v61 }
 0x290   : > { %v599_v30 = vpop.permute.xlu1 %598 }
 0x291   : > { %v568_v0 = vrot.slane %v567_v63, 2 }
 0x293   : > { %v569_v14 = vadd.f32 %v568_v0, %v567_v63 }
 0x295   : > { %v570_v8 = vrot.slane %v569_v14, 1 }
 0x297   : > { %v571_v15 = vadd.f32 %v570_v8, %v569_v14 }
 0x299   : > { %1043 = vpush %v571_v15 }
 0x2ca   : > { %s1044_s17 = spop %1043 }
 0x2cb   : > { %s573_s18 = smul.f32 0.00048828125, %s1044_s17  ;;  %s278_s17 = scalar_lea.vmem %s1400_s7, %s1042_s14 }
 0x2cd   : > { %v574_v7 = vstv %s573_s18 }
 0x2ce   : > { %v575_v17 = vsub.f32 %v559_v57, %v574_v7  ;;  %v576_v18 = vsub.f32 %v561_v59, %v574_v7  ;;  %v647_v59 = vpop.permute.xlu1 %646 }
 0x2d0   : > { %v577_v19 = vmul.f32 %v575_v17, %v575_v17  ;;  %v578_v13 = vmul.f32 %v576_v18, %v576_v18 }
 0x2d2   : > { %v579_v21 = vadd.f32 %v578_v13, %v577_v19  ;;  %v653_v60 = vpop.permute.xlu1 %652 }
 0x2d4   : > { %580 = vadd.xlane.f32.xlu0 %v579_v21 }
 0x2d6   : > { %v691_v61 = vpop.permute.xlu1 %690 }
 0x2da   : > { %v697_v62 = vpop.permute.xlu1 %696 }
 0x2de   : > { %v661_v63 = vpop.permute.xlu1 %660 }
 0x2e2   : > { %v705_v0 = vpop.permute.xlu1 %704 }
 0x2ea   : > { %604 = vperm.xlu0 %1091, %v1280_v16  }
 0x2ee   : > { %1098 = vset.pattern.permute.xlu0 %v1137_v10 }
 0x361   : > { %v581_v2 = vpop.xlane.xlu0 %580 }
 0x362   : > { %v582_v22 = vrot.slane %v581_v2, 4 }
 0x364   : > { %v583_v26 = vadd.f32 %v582_v22, %v581_v2 }
 0x366   : > { %v584_v27 = vrot.slane %v583_v26, 2 }
 0x368   : > { %v585_v28 = vadd.f32 %v584_v27, %v583_v26 }
 0x369   : > { %v605_v34 = vpop.permute.xlu0 %604 }
 0x36a   : > { %v586_v23 = vrot.slane %v585_v28, 1 }
 0x36c   : > { %v587_v29 = vadd.f32 %v586_v23, %v585_v28 }
 0x36e   : > { %1045 = vpush %v587_v29 }
 0x39f   : > { %s1046_s21 = spop %1045 }
 0x3a0   : > { %s589_s22 = smul.f32 0.00048828125, %s1046_s21 }
 0x3a2   : > { %s590_s23 = sadd.f32 1e-05, %s589_s22 }
 0x3a4   : > { %v591_v4 = vstv %s590_s23 }
 0x3a5   : > { %1108 = vrsqrt.f32 %v591_v4 }
 0x3af   : > { %v1109_v5 = vpop.eup %1108 }
 0x3b0   : > { %1047 = vpush %v1109_v5 }
 0x3e1   : > { %s1048_s26 = spop %1047 }
 0x3e2   : > { %v594_v6 = vstv %s1048_s26 }
 0x3e3   : > { %v595_v32 = vmul.f32 %v594_v6, %v575_v17  ;;  %v596_v33 = vmul.f32 %v594_v6, %v576_v18 }
 0x3e5   : > { %v601_v24 = vmul.f32 %v599_v30, %v595_v32  ;;  %v602_v36 = vmul.f32 %v599_v30, %v596_v33 }
 0x3e7   : > { %v607_v37 = vadd.f32 %v605_v34, %v601_v24  ;;  %v608_v38 = vadd.f32 %v605_v34, %v602_v36 }
 0x3e9   : > { %v611_v39 = vmul.f32 %v607_v37, %v607_v37  ;;  %v612_v41 = vmul.f32 %v608_v38, %v608_v38  ;;  %v609_v53 = vmul.f32 0.5, %v607_v37  ;;  %v610_v57 = vmul.f32 0.5, %v608_v38 }
 0x3eb   : > { %v613_v43 = vmul.f32 %v611_v39, %v607_v37  ;;  %v614_v44 = vmul.f32 %v612_v41, %v608_v38 }
 0x3ed   : > { %v615_v45 = vmul.f32 0.044715, %v613_v43  ;;  %v616_v46 = vmul.f32 0.044715, %v614_v44 }
 0x3ef   : > { %v617_v47 = vadd.f32 %v615_v45, %v607_v37  ;;  %v618_v48 = vadd.f32 %v616_v46, %v608_v38 }
 0x3f1   : > { %v619_v49 = vmul.f32 0.7978846, %v617_v47  ;;  %v620_v50 = vmul.f32 0.7978846, %v618_v48 }
 0x3f3   : > { %1110 = vtanh.f32 %v619_v49 }
 0x3f4   : > { %1112 = vtanh.f32 %v620_v50 }
 0x3fd   : > { %v1111_v51 = vpop.eup %1110 }
 0x3fe   : > { %v1113_v52 = vpop.eup %1112  ;;  %v623_v54 = vadd.f32 1.0, %v1111_v51 }
 0x3ff   : > { %v624_v55 = vadd.f32 1.0, %v1113_v52 }
 0x400   : > { %v625_v56 = vmul.f32 %v623_v54, %v609_v53 }
 0x401   : > { %v626_v58 = vmul.f32 %v624_v55, %v610_v57 }
 0x402   : > { %636 = vrot.lane.b32.xlu0 %v625_v56, %s1135_s10  ;;  %628 = vrot.lane.b32.xlu1 %v625_v56, %s1134_s9  ;;  %v655_v13 = vmul.f32 %v653_v60, %v625_v56  ;;  %v699_v21 = vmul.f32 %v697_v62, %v625_v56 }
 0x403   : > { %v656_v29 = vmul.f32 %v653_v60, %v626_v58  ;;  %v700_v40 = vmul.f32 %v697_v62, %v626_v58 }
 0x406   : > { %668 = vperm.xlu0 %1098, %v1313_v1   ;;  %630 = vrot.lane.b32.xlu1 %v626_v58, %s1134_s9 }
 0x40a   : > { %638 = vrot.lane.b32.xlu1 %v626_v58, %s1135_s10  ;;  %1101 = vset.pattern.permute.xlu0 %v1138_v11 }
 0x40b   : > { %732 = vperm.xlu0 %1101, %v1313_v1  }
 0x40e   : > { %674 = vperm.xlu1 %1099, %v1313_v1  }
 0x40f   : > { %1102 = vset.pattern.permute.xlu0 %v1137_v10 }
 0x412   : > { %1100 = vset.pattern.permute.xlu1 %v1139_v12 }
 0x413   : > { %682 = vperm.xlu1 %1100, %v1313_v1  }
 0x417   : > { %1103 = vset.pattern.permute.xlu1 %v1136_v9 }
 0x474   : > { %v629_v14 = vpop.permute.xlu1 %628  ;;  %v637_v18 = vpop.permute.xlu0 %636 }
 0x478   : > { %v631_v11 = vpop.permute.xlu1 %630 }
 0x479   : > { %v632_v8 = vsel %vm324_vm0, %v629_v14, %v631_v11  ;;  %v633_v10 = vsel %vm324_vm0, %v631_v11, %v629_v14 }
 0x47a   : > { %v634_v15 = vsel %vm1235_vm1, %v625_v56, %v633_v10  ;;  %v635_v9 = vsel %vm1239_vm2, %v626_v58, %v632_v8  ;;  %v737_v8 = vld [vmem:[%s1397_s4] sm:$0xff] }
 0x47b   : > { %v649_v7 = vmul.f32 %v647_v59, %v634_v15  ;;  %v693_v17 = vmul.f32 %v691_v61, %v634_v15  ;;  %v650_v26 = vmul.f32 %v647_v59, %v635_v9  ;;  %v694_v30 = vmul.f32 %v691_v61, %v635_v9 }
 0x47c   : > { %v639_v19 = vpop.permute.xlu1 %638 }
 0x47d   : > { %v640_v1 = vsel %vm337_vm4, %v637_v18, %v639_v19  ;;  %v641_v2 = vsel %vm337_vm4, %v639_v19, %v637_v18  ;;  %v701_v27 = vadd.f32 %v699_v21, %v693_v17  ;;  %v657_v28 = vadd.f32 %v655_v13, %v649_v7 }
 0x47e   : > { %v642_v22 = vsel %vm1247_vm3, %v625_v56, %v640_v1  ;;  %v643_v31 = vsel %vm1255_vm5, %v626_v58, %v641_v2  ;;  %v658_v32 = vadd.f32 %v656_v29, %v650_v26  ;;  %v702_v42 = vadd.f32 %v700_v40, %v694_v30 }
 0x47f   : > { %v707_v35 = vmul.f32 %v705_v0, %v642_v22  ;;  %v663_v23 = vmul.f32 %v661_v63, %v642_v22  ;;  %v664_v6 = vmul.f32 %v661_v63, %v643_v31  ;;  %v708_v34 = vmul.f32 %v705_v0, %v643_v31 }
 0x481   : > { %v709_v4 = vadd.f32 %v707_v35, %v701_v27  ;;  %v665_v5 = vadd.f32 %v663_v23, %v657_v28  ;;  %v666_v33 = vadd.f32 %v664_v6, %v658_v32  ;;  %v710_v24 = vadd.f32 %v708_v34, %v702_v42 }
 0x483   : > { %719 = vrot.lane.b32.xlu0 %v709_v4, %s1141_s11  ;;  %711 = vrot.lane.b32.xlu1 %v665_v5, %s1142_s12 }
 0x485   : > { %v669_v37 = vpop.permute.xlu0 %668 }
 0x486   : > { %v671_v41 = vmul.f32 %v669_v37, %v634_v15  ;;  %v672_v43 = vmul.f32 %v669_v37, %v635_v9 }
 0x487   : > { %713 = vrot.lane.b32.xlu1 %v666_v33, %s1142_s12  ;;  %739 = vperm.xlu0 %1102, %v1280_v16   ;;  %v959_v33 = vpop.f32.mrb[2].mxu0 }
 0x488   : > { %v961_v34 = vpop.f32.mrb[3].mxu0 }
 0x48a   : > { %v733_v52 = vpop.permute.xlu0 %732 }
 0x48b   : > { %721 = vrot.lane.b32.xlu1 %v710_v24, %s1141_s11  ;;  %1104 = vset.pattern.permute.xlu0 %v1139_v12 }
 0x48d   : > { %v675_v36 = vpop.permute.xlu1 %674 }
 0x48e   : > { %v677_v38 = vmul.f32 %v675_v36, %v625_v56  ;;  %v678_v39 = vmul.f32 %v675_v36, %v626_v58 }
 0x490   : > { %v679_v45 = vadd.f32 %v677_v38, %v671_v41  ;;  %v680_v46 = vadd.f32 %v678_v39, %v672_v43 }
 0x492   : > { %v683_v44 = vpop.permute.xlu1 %682 }
 0x493   : > { %v685_v47 = vmul.f32 %v683_v44, %v642_v22  ;;  %v686_v48 = vmul.f32 %v683_v44, %v643_v31 }
 0x495   : > { %v687_v49 = vadd.f32 %v685_v47, %v679_v45  ;;  %v688_v50 = vadd.f32 %v686_v48, %v680_v46 }
 0x4f5   : > { %v712_v51 = vpop.permute.xlu1 %711  ;;  %v720_v57 = vpop.permute.xlu0 %719 }
 0x4f9   : > { %v714_v53 = vpop.permute.xlu1 %713 }
 0x4fa   : > { %v716_v54 = vsel %vm312_vm6, %v714_v53, %v712_v51  ;;  %v715_v12 = vsel %vm312_vm6, %v712_v51, %v714_v53 }
 0x4fb   : > { %v717_v55 = vsel %vm312_vm6, %v665_v5, %v716_v54  ;;  %v728_v59 = vadd.f32 %v715_v12, %v688_v50 }
 0x4fc   : > { %v727_v56 = vadd.f32 %v717_v55, %v687_v49 }
 0x4fd   : > { %v722_v58 = vpop.permute.xlu1 %721 }
 0x4fe   : > { %v723_v60 = vsel %vm456_vm7, %v720_v57, %v722_v58  ;;  %v724_v61 = vsel %vm456_vm7, %v722_v58, %v720_v57 }
 0x4ff   : > { %v729_v62 = vadd.f32 %v727_v56, %v723_v60  ;;  %v726_v63 = vsel %vm315_vm8, %v710_v24, %v724_v61 }
 0x500   : > { %v730_v0 = vadd.f32 %v728_v59, %v726_v63 }
 0x501   : > { %v735_v11 = vadd.f32 %v733_v52, %v729_v62 }
 0x502   : > { %v736_v14 = vadd.f32 %v733_v52, %v730_v0 }
 0x504   : > { %746 = vmatprep.subr.mxu1 %v736_v14 }
 0x505   : > { %747 = vmatpush1.msra.mxu1 %v735_v11 }
 0x506   : > { %1035 = vmatmul.mubr.msk.f32.vlgmr.msra.gmra.mrb[0].mxu1 %vm742_vm11, %v737_v8  ;;  %v740_v10 = vpop.permute.xlu0 %739 }
 0x5d9   : > { %v812_v15 = vpop.f32.mrb[0].mxu1 }
 0x5da   : > { %v813_v7 = vadd.f32 %v812_v15, %v740_v10  ;;  %v814_v20 = vpop.f32.mrb[1].mxu1 }
 0x5db   : > { %v815_v17 = vadd.f32 %v814_v20, %v740_v10 }
 0x5dd   : > { %v817_v9 = vadd.f32 %v815_v17, %v813_v7 }
 0x5df   : > { %818 = vadd.xlane.f32.xlu1 %v817_v9 }
 0x5f0   : > { %852 = vperm.xlu1 %1103, %v1280_v16  }
 0x5f4   : > { %1105 = vset.pattern.permute.xlu1 %v1130_v3 }
 0x5f5   : > { %883 = vperm.xlu1 %1105, %v1280_v16  }
 0x66c   : > { %v819_v18 = vpop.xlane.xlu1 %818 }
 0x66d   : > { %v820_v19 = vrot.slane %v819_v18, 4 }
 0x66f   : > { %v821_v13 = vadd.f32 %v820_v19, %v819_v18 }
 0x671   : > { %v822_v21 = vrot.slane %v821_v13, 2 }
 0x673   : > { %v823_v1 = vadd.f32 %v822_v21, %v821_v13 }
 0x675   : > { %v824_v2 = vrot.slane %v823_v1, 1 }
 0x677   : > { %v825_v22 = vadd.f32 %v824_v2, %v823_v1 }
 0x679   : > { %1049 = vpush %v825_v22 }
 0x6aa   : > { %s1050_s8 = spop %1049 }
 0x6ab   : > { %s827_s9 = smul.f32 0.00048828125, %s1050_s8 }
 0x6ad   : > { %v828_v31 = vstv %s827_s9 }
 0x6ae   : > { %v829_v26 = vsub.f32 %v813_v7, %v828_v31  ;;  %v830_v27 = vsub.f32 %v815_v17, %v828_v31 }
 0x6b0   : > { %v831_v35 = vmul.f32 %v829_v26, %v829_v26  ;;  %v832_v28 = vmul.f32 %v830_v27, %v830_v27 }
 0x6b2   : > { %v833_v23 = vadd.f32 %v832_v28, %v831_v35 }
 0x6b4   : > { %834 = vadd.xlane.f32.xlu0 %v833_v23 }
 0x6ca   : > { %858 = vperm.xlu0 %1104, %v1280_v16  }
 0x6ce   : > { %1106 = vset.pattern.permute.xlu0 %v1130_v3  ;;  %v853_v3 = vpop.permute.xlu1 %852 }
 0x6d2   : > { %v884_v12 = vpop.permute.xlu1 %883 }
 0x6d3   : > { %v960_v59 = vadd.f32 %v959_v33, %v884_v12  ;;  %v962_v62 = vadd.f32 %v961_v34, %v884_v12 }
 0x741   : > { %v835_v29 = vpop.xlane.xlu0 %834 }
 0x742   : > { %v836_v4 = vrot.slane %v835_v29, 4 }
 0x744   : > { %v837_v5 = vadd.f32 %v836_v4, %v835_v29 }
 0x746   : > { %v838_v6 = vrot.slane %v837_v5, 2 }
 0x748   : > { %v839_v30 = vadd.f32 %v838_v6, %v837_v5 }
 0x749   : > { %v859_v38 = vpop.permute.xlu0 %858 }
 0x74a   : > { %v840_v32 = vrot.slane %v839_v30, 1 }
 0x74c   : > { %v841_v40 = vadd.f32 %v840_v32, %v839_v30 }
 0x74e   : > { %1051 = vpush %v841_v40 }
 0x77f   : > { %s1052_s10 = spop %1051 }
 0x780   : > { %s843_s11 = smul.f32 0.00048828125, %s1052_s10 }
 0x782   : > { %s844_s12 = sadd.f32 1e-05, %s843_s11 }
 0x784   : > { %v845_v42 = vstv %s844_s12 }
 0x785   : > { %1114 = vrsqrt.f32 %v845_v42 }
 0x78f   : > { %v1115_v24 = vpop.eup %1114 }
 0x790   : > { %1053 = vpush %v1115_v24 }
 0x7c1   : > { %s1054_s13 = spop %1053 }
 0x7c2   : > { %v848_v16 = vstv %s1054_s13 }
 0x7c3   : > { %v849_v36 = vmul.f32 %v848_v16, %v829_v26  ;;  %v850_v37 = vmul.f32 %v848_v16, %v830_v27 }
 0x7c5   : > { %v855_v39 = vmul.f32 %v853_v3, %v849_v36  ;;  %v856_v41 = vmul.f32 %v853_v3, %v850_v37 }
 0x7c7   : > { %v861_v43 = vadd.f32 %v859_v38, %v855_v39  ;;  %v862_v44 = vadd.f32 %v859_v38, %v856_v41 }
 0x7c9   : > { %v865_v45 = vmul.f32 %v861_v43, %v861_v43  ;;  %v866_v46 = vmul.f32 %v862_v44, %v862_v44  ;;  %v863_v57 = vmul.f32 0.5, %v861_v43  ;;  %v864_v60 = vmul.f32 0.5, %v862_v44 }
 0x7cb   : > { %v867_v47 = vmul.f32 %v865_v45, %v861_v43  ;;  %v868_v48 = vmul.f32 %v866_v46, %v862_v44 }
 0x7cd   : > { %v869_v49 = vmul.f32 0.044715, %v867_v47  ;;  %v870_v50 = vmul.f32 0.044715, %v868_v48 }
 0x7cf   : > { %v871_v51 = vadd.f32 %v869_v49, %v861_v43  ;;  %v872_v52 = vadd.f32 %v870_v50, %v862_v44 }
 0x7d1   : > { %v873_v53 = vmul.f32 0.7978846, %v871_v51  ;;  %v874_v54 = vmul.f32 0.7978846, %v872_v52 }
 0x7d3   : > { %1116 = vtanh.f32 %v873_v53 }
 0x7d4   : > { %1118 = vtanh.f32 %v874_v54 }
 0x7dd   : > { %v1117_v55 = vpop.eup %1116 }
 0x7de   : > { %v1119_v56 = vpop.eup %1118  ;;  %v877_v58 = vadd.f32 1.0, %v1117_v55 }
 0x7df   : > { %v878_v61 = vadd.f32 1.0, %v1119_v56 }
 0x7e0   : > { %v879_v63 = vmul.f32 %v877_v58, %v863_v57 }
 0x7e1   : > { %v880_v0 = vmul.f32 %v878_v61, %v864_v60 }
 0x7e2   : > { %v964_v14 = vadd.f32 %v960_v59, %v879_v63 }
 0x7e3   : > { %v965_v11 = vadd.f32 %v962_v62, %v880_v0 }
 0x7e4   : > { %966 = vst [vmem:[%s278_s17] sm:$0xff] %v964_v14 }
 0x7e5   : > { %967 = vst [vmem:[%s278_s17 + $0x8] sm:$0xff] %v965_v11 }
 0x7e6 PF: > { %s17_s24 = sadd.s32 1, %s1126_s24  }
 0x7e7   : > { %p14_p4 = scmp.ge.s32.totalorder %s17_s24, 4  }
 0x7e9   :  { %16 = sbr.rel (!%p14_p4) target bundleno = 1 (0x1), region = 78 }

</bundles_post_ra>
